<compile_context>
chip_gen: v7x
topology: tpu7x:2x2x1
jax: 0.10.0
libtpu: 0.0.40
codegen_flags: <defaults>
</compile_context>

<pallas_src>
import functools

import jax
import jax.numpy as jnp
from jax.experimental import pallas as pl
from jax.experimental.pallas import tpu as pltpu


def _round_up(x, m):
    return (x + m - 1) // m * m


def _mil_kernel(x_ref, wqk_ref, bqk_ref, wt_ref, bt_ref, out_ref, *,
                hidden_dim, vpu_head, mxu_dtype):
    """One (TN, L) row tile of the gated-attention MIL forward."""
    # Cast to the MXU dtype in VMEM (cheap VPU op) instead of in the wrapper (extra HBM pass).
    x = x_ref[...].astype(mxu_dtype)                          # [TN, L]

    # Fused query/key projection: a single MXU pass over x, f32 accumulation.
    qk = jnp.dot(x, wqk_ref[...], preferred_element_type=jnp.float32)
    qk = qk + bqk_ref[...]                                    # [TN, 2D] f32

    a = jnp.tanh(qk[:, :hidden_dim])                          # EUP
    b = jax.nn.sigmoid(qk[:, hidden_dim:])                    # EUP
    g = a * b                                                 # [TN, D]  f32 (VPU)

    if vpu_head:
        # n_classes == 1: the [D, 1] matmul degenerates to a per-row dot product.
        # Do it as a VPU multiply + lane reduction; wt_ref is a [1, D] row.
        out = jnp.sum(g * wt_ref[...], axis=-1, keepdims=True) + bt_ref[...]
    else:
        out = jnp.dot(g.astype(wt_ref.dtype), wt_ref[...],
                      preferred_element_type=jnp.float32) + bt_ref[...]

    out_ref[...] = out.astype(out_ref.dtype)                  # [TN, n_classes]


def attn_based_mil(x, wq, bq, wk, bk, wt, bt, *, block_n=1024,
                   matmul_dtype=jnp.bfloat16):
    """Pallas TPU implementation of the gated-attention MIL forward.

    Args:
      x : [N, L] float32 instance features.
      wq: [L, D] (transposed nn.Linear weight), bq: [1, D]
      wk: [L, D], bk: [1, D]
      wt: [D, n_classes], bt: [1, n_classes]
      block_n: rows (instances) per grid step.
      matmul_dtype: dtype fed to the MXU (accumulation is always f32).

    Returns:
      (A, x) with A: [N, n_classes] -- matching the module's forward.
    """
    N, L = x.shape
    D = wq.shape[1]
    n_classes = wt.shape[1]

    # Fuse the two [L, D] projections into one [L, 2D] matmul (done once, tiny arrays).
    w_qk = jnp.concatenate([wq, wk], axis=1).astype(matmul_dtype)      # [L, 2D]
    b_qk = jnp.concatenate([bq, bk], axis=1).astype(jnp.float32)       # [1, 2D]

    vpu_head = (n_classes == 1)
    if vpu_head:
        wt_arg = wt.reshape(1, D).astype(jnp.float32)                  # [1, D] row
    else:
        wt_arg = wt.astype(matmul_dtype)                               # [D, C]
    bt_arg = bt.astype(jnp.float32)                                    # [1, C]

    # Tile the instance dimension (sublane axis); pad N only if a tile would be partial.
    tn = min(block_n, _round_up(N, 8))
    n_pad = _round_up(N, tn)
    x_in = x if n_pad == N else jnp.pad(x, ((0, n_pad - N), (0, 0)))
    grid = (n_pad // tn,)

    resident = lambda shape: pl.BlockSpec(shape, lambda i: (0,) * len(shape))

    kernel = functools.partial(_mil_kernel, hidden_dim=D, vpu_head=vpu_head,
                               mxu_dtype=matmul_dtype)

    out = pl.pallas_call(
        kernel,
        out_shape=jax.ShapeDtypeStruct((n_pad, n_classes), x.dtype),
        grid=grid,
        in_specs=[
            pl.BlockSpec((tn, L), lambda i: (i, 0)),     # streamed f32 row tiles of x
            resident((L, 2 * D)),                        # fused Wq|Wk, stays in VMEM
            resident((1, 2 * D)),                        # fused bq|bk
            resident(wt_arg.shape),                      # head weight
            resident((1, n_classes)),                    # head bias
        ],
        out_specs=pl.BlockSpec((tn, n_classes), lambda i: (i, 0)),
        compiler_params=pltpu.CompilerParams(
            dimension_semantics=("parallel",),           # shard row tiles across TCs (v7x)
        ),
    )(x_in, w_qk, b_qk, wt_arg, bt_arg)

    return out[:N], x


def _reference(x, wq, bq, wk, bk, wt, bt):
    a = jnp.tanh(x @ wq + bq)
    b = jax.nn.sigmoid(x @ wk + bk)
    return (a * b) @ wt + bt


def _init_params(key, L, D, n_classes, dtype=jnp.float32):
    k1, k2, k3, k4, k5, k6 = jax.random.split(key, 6)
    lim_q = 1.0 / jnp.sqrt(L)
    lim_t = 1.0 / jnp.sqrt(D)
    wq = jax.random.uniform(k1, (L, D), dtype, -lim_q, lim_q)
    bq = jax.random.uniform(k2, (1, D), dtype, -lim_q, lim_q)
    wk = jax.random.uniform(k3, (L, D), dtype, -lim_q, lim_q)
    bk = jax.random.uniform(k4, (1, D), dtype, -lim_q, lim_q)
    wt = jax.random.uniform(k5, (D, n_classes), dtype, -lim_t, lim_t)
    bt = jax.random.uniform(k6, (1, n_classes), dtype, -lim_t, lim_t)
    return wq, bq, wk, bk, wt, bt


if __name__ == "__main__":
    key = jax.random.PRNGKey(0)

    # Case 1: single-class head (VPU-reduce path), tiny bag -> single grid step.
    N, L, D, C = 8, 128, 128, 1
    kx, kp, key = jax.random.split(key, 3)
    x = jax.random.normal(kx, (N, L), jnp.float32)
    params = _init_params(kp, L, D, C)
    A, x_out = attn_based_mil(x, *params)
    jax.block_until_ready((A, x_out))
    A_ref = _reference(x, *params)
    assert A.shape == (N, C)
    assert jnp.allclose(A, A_ref, atol=2e-2, rtol=2e-2), "case 1 mismatch vs reference"
    assert jnp.array_equal(x_out, x)

    # Case 2: multi-class head (MXU head path), N not a multiple of the tile -> padding,
    # multiple grid steps exercising the pipelined / parallel row-tile path.
    N, L, D, C = 300, 384, 128, 9
    kx, kp, key = jax.random.split(key, 3)
    x = jax.random.normal(kx, (N, L), jnp.float32)
    params = _init_params(kp, L, D, C)
    A, x_out = attn_based_mil(x, *params, block_n=256)
    jax.block_until_ready((A, x_out))
    A_ref = _reference(x, *params)
    assert A.shape == (N, C)
    assert jnp.allclose(A, A_ref, atol=2e-2, rtol=2e-2), "case 2 mismatch vs reference"
    assert jnp.array_equal(x_out, x)

    print("KERNEL_OK")
</pallas_src>

<mosaic_0001>
module attributes {stable_mosaic.version = 11 : i64} {
  func.func @_mil_kernel(%arg0: i32, %arg1: memref<8x128xf32, #tpu.memory_space<vmem>>, %arg2: memref<128x256xbf16, #tpu.memory_space<vmem>>, %arg3: memref<1x256xf32, #tpu.memory_space<vmem>>, %arg4: memref<1x128xf32, #tpu.memory_space<vmem>>, %arg5: memref<1x1xf32, #tpu.memory_space<vmem>>, %arg6: memref<8x1xf32, #tpu.memory_space<vmem>>) attributes {dimension_semantics = [#tpu.dimension_semantics<parallel>], iteration_bounds = array<i64: 1>, scalar_prefetch = 0 : i64, scratch_operands = 0 : i64, tpu.core_type = #tpu.core_type<tc>, window_params = [{transform_indices = @transform_0, window_bounds = array<i64: 8, 128>}, {pipeline_mode = #tpu.pipeline_mode<synchronous>, transform_indices = @transform_1, window_bounds = array<i64: 128, 256>}, {pipeline_mode = #tpu.pipeline_mode<synchronous>, transform_indices = @transform_2, window_bounds = array<i64: 1, 256>}, {pipeline_mode = #tpu.pipeline_mode<synchronous>, transform_indices = @transform_3, window_bounds = array<i64: 1, 128>}, {pipeline_mode = #tpu.pipeline_mode<synchronous>, transform_indices = @transform_4, window_bounds = array<i64: 1, 1>}, {transform_indices = @transform_5, window_bounds = array<i64: 8, 1>}]} {
    %c0 = arith.constant 0 : index
    %c0_0 = arith.constant 0 : index
    %0 = vector.load %arg1[%c0, %c0_0] : memref<8x128xf32, #tpu.memory_space<vmem>>, vector<8x128xf32>
    %1 = arith.truncf %0 : vector<8x128xf32> to vector<8x128xbf16>
    %c0_1 = arith.constant 0 : index
    %c0_2 = arith.constant 0 : index
    %2 = vector.load %arg2[%c0_1, %c0_2] : memref<128x256xbf16, #tpu.memory_space<vmem>>, vector<128x256xbf16>
    %cst = arith.constant dense<0.000000e+00> : vector<8x256xf32>
    %3 = tpu.matmul %1, %2, %cst {dimension_numbers = #tpu.dot_dimension_numbers<[1], [0], [0], [1], [0, 0, 1, 1], [], []>} : vector<8x128xbf16>, vector<128x256xbf16>, vector<8x256xf32> -> vector<8x256xf32>
    %c0_3 = arith.constant 0 : index
    %c0_4 = arith.constant 0 : index
    %4 = vector.load %arg3[%c0_3, %c0_4] : memref<1x256xf32, #tpu.memory_space<vmem>>, vector<1x256xf32>
    %5 = vector.broadcast %4 : vector<1x256xf32> to vector<8x256xf32>
    %6 = arith.addf %3, %5 : vector<8x256xf32>
    %7 = vector.extract_strided_slice %6 {offsets = [0, 0], sizes = [8, 128], strides = [1, 1]} : vector<8x256xf32> to vector<8x128xf32>
    %8 = math.tanh %7 : vector<8x128xf32>
    %9 = vector.extract_strided_slice %6 {offsets = [0, 128], sizes = [8, 128], strides = [1, 1]} : vector<8x256xf32> to vector<8x128xf32>
    %10 = arith.negf %9 : vector<8x128xf32>
    %11 = math.exp %10 : vector<8x128xf32>
    %cst_5 = arith.constant 1.000000e+00 : f32
    %12 = vector.broadcast %cst_5 : f32 to vector<8x128xf32>
    %13 = arith.addf %12, %11 : vector<8x128xf32>
    %14 = arith.divf %12, %13 : vector<8x128xf32>
    %15 = arith.mulf %8, %14 : vector<8x128xf32>
    %c0_6 = arith.constant 0 : index
    %c0_7 = arith.constant 0 : index
    %16 = vector.load %arg4[%c0_6, %c0_7] : memref<1x128xf32, #tpu.memory_space<vmem>>, vector<1x128xf32>
    %17 = vector.broadcast %16 : vector<1x128xf32> to vector<8x128xf32>
    %18 = arith.mulf %15, %17 : vector<8x128xf32>
    %cst_8 = arith.constant dense<0.000000e+00> : vector<8xf32>
    %19 = vector.multi_reduction <add>, %18, %cst_8 [1] : vector<8x128xf32> to vector<8xf32>
    %20 = vector.shape_cast %19 : vector<8xf32> to vector<8x1xf32>
    %c0_9 = arith.constant 0 : index
    %c0_10 = arith.constant 0 : index
    %21 = vector.load %arg5[%c0_9, %c0_10] : memref<1x1xf32, #tpu.memory_space<vmem>>, vector<1x1xf32>
    %22 = vector.broadcast %21 : vector<1x1xf32> to vector<8x1xf32>
    %23 = arith.addf %20, %22 : vector<8x1xf32>
    %c0_11 = arith.constant 0 : index
    %c0_12 = arith.constant 0 : index
    %24 = vector.load %arg6[%c0_11, %c0_12] : memref<8x1xf32, #tpu.memory_space<vmem>>, vector<8x1xf32>
    tpu.vector_store %arg6[%c0_11, %c0_12], %23 {strides = array<i32>} : memref<8x1xf32, #tpu.memory_space<vmem>>, vector<8x1xf32>,
    return
  }
  func.func @transform_0(%arg0: i32) -> (i32, i32) {
    %c0_i32 = arith.constant 0 : i32
    %c0_i32_0 = arith.constant 0 : i32
    return %arg0, %c0_i32 : i32, i32
  }
  func.func @transform_1(%arg0: i32) -> (i32, i32) {
    %c0_i32 = arith.constant 0 : i32
    %c0_i32_0 = arith.constant 0 : i32
    %c0_i32_1 = arith.constant 0 : i32
    return %c0_i32, %c0_i32_0 : i32, i32
  }
  func.func @transform_2(%arg0: i32) -> (i32, i32) {
    %c0_i32 = arith.constant 0 : i32
    %c0_i32_0 = arith.constant 0 : i32
    %c0_i32_1 = arith.constant 0 : i32
    return %c0_i32, %c0_i32_0 : i32, i32
  }
  func.func @transform_3(%arg0: i32) -> (i32, i32) {
    %c0_i32 = arith.constant 0 : i32
    %c0_i32_0 = arith.constant 0 : i32
    %c0_i32_1 = arith.constant 0 : i32
    return %c0_i32, %c0_i32_0 : i32, i32
  }
  func.func @transform_4(%arg0: i32) -> (i32, i32) {
    %c0_i32 = arith.constant 0 : i32
    %c0_i32_0 = arith.constant 0 : i32
    %c0_i32_1 = arith.constant 0 : i32
    return %c0_i32, %c0_i32_0 : i32, i32
  }
  func.func @transform_5(%arg0: i32) -> (i32, i32) {
    %c0_i32 = arith.constant 0 : i32
    %c0_i32_0 = arith.constant 0 : i32
    return %arg0, %c0_i32 : i32, i32
  }
}

</mosaic_0001>

<bundles_post_ra>
// kernel: tpu_custom_call.1
= control target key start
LH: loop header
LB: loop body
LE: loop exit
PB: predicated region body
PF: predicated region fallthrough
CT: control target
= control target key end

     0   :  { %s414_s0 = inlined_call_operand.hbm [shape: f32[8,128], index: 0, kind: input, shape index: {}]   ;;  %s415_s1 = inlined_call_operand.hbm [shape: bf16[128,256], index: 1, kind: input, shape index: {}]   ;;  %s416_s2 = inlined_call_operand.vmem [shape: f32[1,256], index: 2, kind: input, shape index: {}]   ;;  %s417_s3 = inlined_call_operand.vmem [shape: f32[1,128], index: 3, kind: input, shape index: {}]   ;;  %s418_s4 = inlined_call_operand.<no memory space> [shape: f32[1,1], index: 4, kind: input, shape index: {}]   ;;  %s419_s5 = inlined_call_operand.vmem [shape: f32[8,1], index: 5, kind: output, shape index: {}]  }
   0x1   :  { %v10_v0 = vstv %s418_s4 }
   0x2   :  { %11 = vst [vmem:[#allocation2] sm:$0x1] %v10_v0 }
   0x3   :  { %12 = vsyncpa [#allocation4], 0 }
   0x4   :  { %13 = vsyncpa [#allocation6], 0  ;;  %s336_s20 = smov [#allocation3]   ;;  %s337_s22 = smov [#allocation5]  }
   0x5   :  { %s20_s21 = sshll.u32 %s336_s20, 4  ;;  %s29_s23 = sshll.u32 %s337_s22, 4  ;;  %s21_s21 = int_to_ptr.vmem [resolvable:$true] %s20_s21  ;;  %s374_s23 = int_to_ptr.vmem [resolvable:$true] %s29_s23 }
   0x6   :  { %s288_s26 = scalar_lea.hbm %s414_s0, 128 }
   0x7   :  { %p289_p0 = scmp.ne.s32.totalorder %s414_s0, %s288_s26  ;;  %p292_p1 = scmp.lt.u32.totalorder %s288_s26, %s414_s0 }
   0x9   :  { %p294_p2 = pnand %p292_p1, %p289_p0 }
   0xb   :  { %297 = shalt.err (!%p294_p2)
}
   0xc   :  { %s298_s30 = scalar_lea.vmem %s21_s21, 128  ;;  %p303_p4 = scmp.lt.s32.totalorder %s21_s21, %s21_s21 }
   0xd   :  { %p299_p3 = scmp.ne.s32.totalorder %s21_s21, %s298_s30  ;;  %p304_p5 = scmp.lt.s32.totalorder %s298_s30, %s298_s30 }
   0xf   :  { %p305_p6 = por %p304_p5, %p303_p4 }
  0x11   :  { %p306_p7 = pnand %p305_p6, %p299_p3 }
  0x13   :  { %309 = shalt.err (!%p306_p7)
}
  0x14   :  { %23 = dma.hbm_to_vmem [thread:$0]  %s414_s0, 128, %s21_s21, [#allocation4]  }
  0x15   :  { %s310_s10 = scalar_lea.hbm %s415_s1, 2048 }
  0x16   :  { %p311_p8 = scmp.ne.s32.totalorder %s415_s1, %s310_s10  ;;  %p314_p9 = scmp.lt.u32.totalorder %s310_s10, %s415_s1 }
  0x18   :  { %p316_p10 = pnand %p314_p9, %p311_p8 }
  0x1a   :  { %319 = shalt.err (!%p316_p10)
}
  0x1b   :  { %s320_s15 = scalar_lea.vmem %s374_s23, 2048  ;;  %p325_p12 = scmp.lt.s32.totalorder %s374_s23, %s374_s23 }
  0x1c   :  { %p321_p11 = scmp.ne.s32.totalorder %s374_s23, %s320_s15  ;;  %p326_p13 = scmp.lt.s32.totalorder %s320_s15, %s320_s15 }
  0x1e   :  { %p327_p0 = por %p326_p13, %p325_p12 }
  0x20   :  { %p328_p1 = pnand %p327_p0, %p321_p11 }
  0x22   :  { %331 = shalt.err (!%p328_p1)
}
  0x23   :  { %s338_s0 = smov 128   ;;  %s339_s16 = smov 8  }
  0x24   :  { %35 = dma.hbm_to_vmem [thread:$0]  %s415_s1, 2048, %s374_s23, [#allocation6], %s338_s0, %s338_s0, %s339_s16  }
  0x25   :  { %332 = dma.done.wait [#allocation4], 128  }
  0x26   :  { %333 = vsyncadd [#allocation4], 4294967168 }
  0x27   :  { %334 = dma.done.wait [#allocation6], 2048  }
  0x28   :  { %335 = vsyncadd [#allocation6], 4294965248  ;;  %v340_v1 = vmov 0   ;;  %v258_v2 = vld [vmem:[#allocation5 + $0x4] ss:$8 sps:$4 sm:$0xff]   ;;  %v49_v18 = vld [vmem:[#allocation3] sm:$0xff]  ;;  %v69_v20 = vlaneseq }
  0x29   :  { %191 = vmatprep.mubr.bf16.mxu0 %v340_v1  ;;  %v260_v3 = vld [vmem:[#allocation5] ss:$8 sps:$4 sm:$0xff]   ;;  %159 = vmatprep.subr.bf16.mxu0 %v258_v2  ;;  %v261_v4 = vld [vmem:[#allocation5 + $0x14] ss:$8 sps:$4 sm:$0xff]   ;;  %v263_v5 = vld [vmem:[#allocation5 + $0x10] ss:$8 sps:$4 sm:$0xff]   ;;  %v50_v19 = vpack.c.bf16 %v49_v18, %v49_v18 }
  0x2a   :  { %160 = vmatpush1.bf16.msra.mxu0 %v260_v3  ;;  %v264_v6 = vld [vmem:[#allocation5 + $0x24] ss:$8 sps:$4 sm:$0xff]   ;;  %v266_v7 = vld [vmem:[#allocation5 + $0x20] ss:$8 sps:$4 sm:$0xff]   ;;  %v267_v8 = vld [vmem:[#allocation5 + $0x34] ss:$8 sps:$4 sm:$0xff]  }
  0x2b   :  { %161 = vmatprep.subr.bf16.mxu0 %v261_v4  ;;  %v269_v9 = vld [vmem:[#allocation5 + $0x30] ss:$8 sps:$4 sm:$0xff]   ;;  %v270_v10 = vld [vmem:[#allocation5 + $0x44] ss:$8 sps:$4 sm:$0xff]   ;;  %v272_v11 = vld [vmem:[#allocation5 + $0x40] ss:$8 sps:$4 sm:$0xff]  }
  0x2c   :  { %v273_v12 = vld [vmem:[#allocation5 + $0x54] ss:$8 sps:$4 sm:$0xff]   ;;  %v275_v13 = vld [vmem:[#allocation5 + $0x50] ss:$8 sps:$4 sm:$0xff]   ;;  %v276_v14 = vld [vmem:[#allocation5 + $0x64] ss:$8 sps:$4 sm:$0xff]  }
  0x2d   :  { %v278_v15 = vld [vmem:[#allocation5 + $0x60] ss:$8 sps:$4 sm:$0xff]   ;;  %v279_v16 = vld [vmem:[#allocation5 + $0x74] ss:$8 sps:$4 sm:$0xff]   ;;  %v281_v17 = vld [vmem:[#allocation5 + $0x70] ss:$8 sps:$4 sm:$0xff]  }
  0x2e   :  { %162 = vmatpush1.bf16.msra.mxu0 %v263_v5  ;;  %v70_v21 = vshrl.u32 %v69_v20, 7  ;;  %v67_v23 = vld [vmem:[%s416_s2] sm:$0x3]  ;;  %vm226_vm0 = vcmask 7168  }
  0x2f   :  { %163 = vmatprep.subr.bf16.mxu0 %v264_v6  ;;  %v251_v38 = vld [vmem:[%s417_s3] ss:$0 sm:$0xff] }
  0x30   :  { %v75_v22 = vsub.s32 1, %v70_v21  ;;  %v71_v31 = vsub.s32 0, %v70_v21  ;;  %v252_v41 = vld [vmem:[#allocation2] ss:$0 sm:$0xff] }
  0x32   :  { %164 = vmatpush1.bf16.msra.mxu0 %v266_v7  ;;  %v76_v24 = vrot.slane %v67_v23, %v75_v22  ;;  %v72_v32 = vrot.slane %v67_v23, %v71_v31 }
  0x33   :  { %165 = vmatprep.subr.bf16.mxu0 %v267_v8 }
  0x36   :  { %166 = vmatpush1.bf16.msra.mxu0 %v269_v9 }
  0x37   :  { %167 = vmatprep.subr.bf16.mxu0 %v270_v10 }
  0x3a   :  { %168 = vmatpush1.bf16.msra.mxu0 %v272_v11 }
  0x3b   :  { %169 = vmatprep.subr.bf16.mxu0 %v273_v12 }
  0x3e   :  { %170 = vmatpush1.bf16.msra.mxu0 %v275_v13 }
  0x3f   :  { %171 = vmatprep.subr.bf16.mxu0 %v276_v14 }
  0x42   :  { %172 = vmatpush1.bf16.msra.mxu0 %v278_v15 }
  0x43   :  { %173 = vmatprep.subr.bf16.mxu0 %v279_v16 }
  0x46   :  { %174 = vmatpush1.bf16.msra.mxu0 %v281_v17 }
  0x49   :  { %192 = vmatmul.mubr.bf16.vlgmr.msra.gmra.mrb[0].mxu0 %v50_v19 }
 0x11c   :  { %v193_v25 = vpop.f32.mrb[0].mxu0 }
 0x11d   :  { %v195_v26 = vpop.f32.mrb[1].mxu0  ;;  %v194_v33 = vadd.f32 %v193_v25, %v72_v32 }
 0x11e   :  { %v196_v27 = vadd.f32 %v195_v26, %v76_v24  ;;  %v197_v28 = vpop.f32.mrb[2].mxu0 }
 0x11f   :  { %v198_v29 = vpop.f32.mrb[3].mxu0 }
 0x120   :  { %v250_v30 = vmul.f32 -1.442695, %v196_v27 }
 0x122   :  { %282 = vpow2.f32 %v250_v30 }
 0x123   :  { %284 = vtanh.f32 %v194_v33 }
 0x12c   :  { %v283_v34 = vpop.eup %282 }
 0x12d   :  { %v204_v35 = vadd.f32 1.0, %v283_v34  ;;  %v285_v36 = vpop.eup %284 }
 0x12f   :  { %286 = vrcp.f32 %v204_v35 }
 0x139   :  { %v287_v37 = vpop.eup %286 }
 0x13a   :  { %v207_v39 = vmul.f32 %v287_v37, %v285_v36 }
 0x13c   :  { %v215_v40 = vmul.f32 %v251_v38, %v207_v39 }
 0x13e   :  { %216 = vadd.xlane.f32.xlu0 %v215_v40 }
 0x1cb   :  { %v217_v42 = vpop.xlane.xlu0 %216 }
 0x1cc   :  { %v225_v43 = vadd.f32 %v252_v41, %v217_v42 }
 0x1ce   :  { %227 = vst.msk [vmem:[%s419_s5] sm:$0xff] %vm226_vm0, %v225_v43 }
 0x1cf   :  { %232 = vsyncpa [#allocation4], 1 }
 0x1d0   :  { %233 = vsyncpa [#allocation6], 1 }

</bundles_post_ra>
